<compile_context>
chip_gen: v5e
topology: v5e:2x2
jax: 0.10.0
libtpu: 0.0.40
codegen_flags: <defaults>
</compile_context>

<pallas_src>
import jax
import jax.numpy as jnp
from jax.experimental import pallas as pl
from jax.experimental.pallas import tpu as pltpu


def _outconv_kernel(w_ref, b_ref, x_ref, o_ref):
    # w_ref: (C_out, C_in)   -- resident (constant index_map)
    # b_ref: (C_out, 1)      -- resident, broadcast along the lane axis
    # x_ref: (C_in, TS)      -- one spatial tile of one image
    # o_ref: (C_out, TS)     -- lane-dense output tile
    acc = jnp.dot(w_ref[...], x_ref[...], preferred_element_type=jnp.float32)
    o_ref[...] = (acc + b_ref[...]).astype(o_ref.dtype)


def _vmem_limit_bytes():
    """Per-generation scoped-VMEM limit: ~3/4 of physical, capped at 64 MiB.
    v7x (64 MiB/TC) -> 48 MiB; v5e/v6e (128 MiB) -> 64 MiB."""
    try:
        cap = pltpu.get_tpu_info().vmem_capacity_bytes
    except Exception:
        cap = 64 << 20  # conservative (v7x per-TC) fallback
    return int(min(cap * 3 // 4, 64 << 20))


def _pick_spatial_tile(hw, c_in, c_out, itemsize, n_batch, vmem_budget,
                       max_ts=16384):
    """Largest 128-multiple spatial tile that (a) fits double-buffered in+out
    blocks in the VMEM budget, (b) is capped at max_ts, (c) doesn't exceed the
    128-rounded spatial extent, and (d) leaves >= 4 total grid steps so both
    v7x TensorCores get work even at batch 1."""
    per_col = 2 * (c_in + c_out) * itemsize          # in + out, double-buffered
    ts = (vmem_budget // per_col) // 128 * 128
    ts = max(128, min(ts, max_ts))
    hw_128 = pl.cdiv(hw, 128) * 128
    ts = min(ts, hw_128)
    min_tiles_per_img = -(-4 // n_batch)             # ceil(4 / N)
    if min_tiles_per_img > 1:
        ts_cap = max(128, (hw_128 // min_tiles_per_img) // 128 * 128)
        ts = min(ts, ts_cap)
    return ts


def outconv(x_nchw, weight, bias, *, spatial_tile=None):
    """1x1 Conv2d forward (nn.Conv2d(C_in, C_out, kernel_size=1)).

    x_nchw: (N, C_in, H, W)
    weight: (C_out, C_in, 1, 1)   (PyTorch Conv2d layout)
    bias:   (C_out,)
    returns (N, C_out, H, W)
    """
    N, C_in, H, W = x_nchw.shape
    C_out = weight.shape[0]
    HW = H * W
    itemsize = jnp.dtype(x_nchw.dtype).itemsize

    vmem_limit = _vmem_limit_bytes()
    if spatial_tile is not None:
        # Round a user-supplied tile up to a lane multiple.
        ts = max(128, -(-int(spatial_tile) // 128) * 128)
    else:
        # Leave ~8 MiB headroom for weight/bias, semaphores, internal scratch.
        budget = max(1 << 20, vmem_limit - (8 << 20))
        ts = _pick_spatial_tile(HW, C_in, C_out, itemsize, N, budget)

    # Free views only — no transpose, no pad, no output slice.
    x_flat = x_nchw.reshape(N, C_in, HW)
    w_mat = weight.reshape(C_out, C_in)
    b_col = bias.reshape(C_out, 1)

    grid = (N, pl.cdiv(HW, ts))

    cost = pl.CostEstimate(
        flops=2 * N * HW * C_in * C_out,
        transcendentals=0,
        bytes_accessed=itemsize * (N * HW * C_in + N * HW * C_out)
        + jnp.dtype(weight.dtype).itemsize * (C_out * C_in + C_out),
    )

    out_flat = pl.pallas_call(
        _outconv_kernel,
        out_shape=jax.ShapeDtypeStruct((N, C_out, HW), x_nchw.dtype),
        grid_spec=pltpu.PrefetchScalarGridSpec(
            num_scalar_prefetch=0,
            grid=grid,
            in_specs=[
                # Weight / bias: constant index_map -> resident across the grid.
                pl.BlockSpec((C_out, C_in), lambda n, s: (0, 0)),
                pl.BlockSpec((C_out, 1), lambda n, s: (0, 0)),
                # Input: one image (squeezed), all channels, one spatial tile.
                # The ragged last tile (HW % ts != 0) is masked by Pallas.
                pl.BlockSpec((pl.Squeezed(), C_in, ts), lambda n, s: (n, 0, s)),
            ],
            out_specs=pl.BlockSpec((pl.Squeezed(), C_out, ts),
                                   lambda n, s: (n, 0, s)),
        ),
        compiler_params=pltpu.CompilerParams(
            dimension_semantics=("parallel", "parallel"),
            vmem_limit_bytes=vmem_limit),
        cost_estimate=cost,
    )(w_mat, b_col, x_flat)

    return out_flat.reshape(N, C_out, H, W)


if __name__ == "__main__":
    key = jax.random.PRNGKey(0)
    kx, kw, kb = jax.random.split(key, 3)

    N, C_in, C_out, Hs, Ws = 2, 4, 8, 16, 16

    x = jax.random.normal(kx, (N, C_in, Hs, Ws), dtype=jnp.float32)
    # Synthetic parameters in PyTorch Conv2d layout: (C_out, C_in, 1, 1), (C_out,)
    weight = jax.random.normal(kw, (C_out, C_in, 1, 1), dtype=jnp.float32) * 0.1
    bias = jax.random.normal(kb, (C_out,), dtype=jnp.float32) * 0.1

    out = jax.block_until_ready(outconv(x, weight, bias))

    # Reference: plain JAX semantics of a 1x1 conv + bias.
    ref = jnp.einsum("nchw,oc->nohw", x, weight.reshape(C_out, C_in)) \
        + bias[None, :, None, None]
    assert out.shape == (N, C_out, Hs, Ws)
    assert jnp.allclose(out, ref, atol=1e-5, rtol=1e-5)

    # Non-tile-multiple spatial size: exercises the masked ragged last block
    # (no pad/slice anywhere in the wrapper).
    Ho, Wo = 13, 11
    x2 = jax.random.normal(kx, (N, C_in, Ho, Wo), dtype=jnp.float32)
    out2 = jax.block_until_ready(outconv(x2, weight, bias))
    ref2 = jnp.einsum("nchw,oc->nohw", x2, weight.reshape(C_out, C_in)) \
        + bias[None, :, None, None]
    assert out2.shape == (N, C_out, Ho, Wo)
    assert jnp.allclose(out2, ref2, atol=1e-5, rtol=1e-5)

    # Also exercise the user-supplied-tile path (rounded to a lane multiple).
    out3 = jax.block_until_ready(outconv(x, weight, bias, spatial_tile=100))
    assert jnp.allclose(out3, ref, atol=1e-5, rtol=1e-5)

    print("KERNEL_OK")
</pallas_src>

<mosaic_0001>
module attributes {stable_mosaic.version = 11 : i64} {
  func.func @_outconv_kernel(%arg0: i32, %arg1: i32, %arg2: memref<8x4xf32, #tpu.memory_space<vmem>>, %arg3: memref<8x1xf32, #tpu.memory_space<vmem>>, %arg4: memref<1x4x128xf32, #tpu.memory_space<vmem>>, %arg5: memref<1x8x128xf32, #tpu.memory_space<vmem>>) attributes {dimension_semantics = [#tpu.dimension_semantics<parallel>, #tpu.dimension_semantics<parallel>], iteration_bounds = array<i64: 2, 2>, scalar_prefetch = 0 : i64, scratch_operands = 0 : i64, tpu.core_type = #tpu.core_type<tc>, window_params = [{pipeline_mode = #tpu.pipeline_mode<synchronous>, transform_indices = @transform_0, window_bounds = array<i64: 8, 4>}, {pipeline_mode = #tpu.pipeline_mode<synchronous>, transform_indices = @transform_1, window_bounds = array<i64: 8, 1>}, {transform_indices = @transform_2, window_bounds = array<i64: 1, 4, 128>}, {transform_indices = @transform_3, window_bounds = array<i64: 1, 8, 128>}]} {
    %c0 = arith.constant 0 : index
    %c0_0 = arith.constant 0 : index
    %0 = vector.load %arg2[%c0, %c0_0] : memref<8x4xf32, #tpu.memory_space<vmem>>, vector<8x4xf32>
    %c0_1 = arith.constant 0 : index
    %c0_2 = arith.constant 0 : index
    %c0_3 = arith.constant 0 : index
    %1 = vector.load %arg4[%c0_1, %c0_2, %c0_3] : memref<1x4x128xf32, #tpu.memory_space<vmem>>, vector<1x4x128xf32>
    %2 = vector.shape_cast %1 : vector<1x4x128xf32> to vector<4x128xf32>
    %cst = arith.constant dense<0.000000e+00> : vector<8x128xf32>
    %3 = tpu.matmul %0, %2, %cst {dimension_numbers = #tpu.dot_dimension_numbers<[1], [0], [0], [1], [0, 0, 1, 1], [], []>} : vector<8x4xf32>, vector<4x128xf32>, vector<8x128xf32> -> vector<8x128xf32>
    %c0_4 = arith.constant 0 : index
    %c0_5 = arith.constant 0 : index
    %4 = vector.load %arg3[%c0_4, %c0_5] : memref<8x1xf32, #tpu.memory_space<vmem>>, vector<8x1xf32>
    %5 = vector.broadcast %4 : vector<8x1xf32> to vector<8x128xf32>
    %6 = arith.addf %3, %5 : vector<8x128xf32>
    %c0_6 = arith.constant 0 : index
    %c0_7 = arith.constant 0 : index
    %c0_8 = arith.constant 0 : index
    %7 = vector.load %arg5[%c0_6, %c0_7, %c0_8] : memref<1x8x128xf32, #tpu.memory_space<vmem>>, vector<1x8x128xf32>
    %8 = vector.shape_cast %7 : vector<1x8x128xf32> to vector<8x128xf32>
    %9 = vector.shape_cast %6 : vector<8x128xf32> to vector<1x8x128xf32>
    tpu.vector_store %arg5[%c0_6, %c0_7, %c0_8], %9 {strides = array<i32>} : memref<1x8x128xf32, #tpu.memory_space<vmem>>, vector<1x8x128xf32>,
    return
  }
  func.func @transform_0(%arg0: i32, %arg1: i32) -> (i32, i32) {
    %c0_i32 = arith.constant 0 : i32
    %c0_i32_0 = arith.constant 0 : i32
    %c0_i32_1 = arith.constant 0 : i32
    return %c0_i32, %c0_i32_0 : i32, i32
  }
  func.func @transform_1(%arg0: i32, %arg1: i32) -> (i32, i32) {
    %c0_i32 = arith.constant 0 : i32
    %c0_i32_0 = arith.constant 0 : i32
    %c0_i32_1 = arith.constant 0 : i32
    return %c0_i32, %c0_i32_0 : i32, i32
  }
  func.func @transform_2(%arg0: i32, %arg1: i32) -> (i32, i32, i32) {
    %c0_i32 = arith.constant 0 : i32
    %c0_i32_0 = arith.constant 0 : i32
    return %arg0, %c0_i32, %arg1 : i32, i32, i32
  }
  func.func @transform_3(%arg0: i32, %arg1: i32) -> (i32, i32, i32) {
    %c0_i32 = arith.constant 0 : i32
    %c0_i32_0 = arith.constant 0 : i32
    return %arg0, %c0_i32, %arg1 : i32, i32, i32
  }
}

</mosaic_0001>

<bundles_post_ra>
// kernel: tpu_custom_call.1
= control target key start
LH: loop header
LB: loop body
LE: loop exit
PB: predicated region body
PF: predicated region fallthrough
CT: control target
= control target key end

     0   :  { %8 = vsyncpa [#allocation3], 0  ;;  %s660_s0 = inlined_call_operand.vmem [shape: f32[8,4], index: 0, kind: input, shape index: {}]   ;;  %s661_s1 = inlined_call_operand.vmem [shape: f32[8,1], index: 1, kind: input, shape index: {}]   ;;  %s662_s2 = inlined_call_operand.vmem [shape: f32[2,4,256], index: 2, kind: input, shape index: {}]   ;;  %s663_s3 = inlined_call_operand.hbm [shape: f32[2,8,256], index: 3, kind: output, shape index: {}]  }
   0x1   :  { %10 = vsyncpa [#allocation3 + $0x1], 0  ;;  %s532_s12 = smov 0   ;;  %s534_s13 = smov 0  }
   0x2   :  { %s536_s14 = smov 0   ;;  %s538_s15 = smov 0  }
   0x3   :  { %s540_s16 = smov 0   ;;  %s542_s17 = smov 0  }
   0x4   :  { %s544_s18 = smov 0   ;;  %s546_s19 = smov 0  }
   0x5 LB: > { %s327_s20 = sadd.s32 4294967295, %s509_s19   ;;  %s328_s21 = sadd.s32 4294967294, %s509_s19   ;;  %s509_s19 = sphi %s546_s19, %s16_s19   ;;  %s505_s18 = sphi %s544_s18, %s672_s18   ;;  %s501_s17 = sphi %s542_s17, %s671_s17   ;;  %s497_s16 = sphi %s540_s16, %s670_s16   ;;  %s493_s15 = sphi %s538_s15, %s669_s15   ;;  %s489_s14 = sphi %s536_s14, %s668_s14   ;;  %s485_s13 = sphi %s534_s13, %s667_s13   ;;  %s481_s12 = sphi %s532_s12, %s666_s12  }
   0x6   : > { %s25_s22 = sadd.s32 1, %s501_s17  ;;  %s28_s23 = sadd.s32 1, %s505_s18 }
   0x7   : > { %p26_p0 = scmp.ge.s32.totalorder %s25_s22, 2  ;;  %p117_p1 = scmp.ne.s32.totalorder %s489_s14, %s485_s13 }
   0x8   : > { %p118_p2 = scmp.eq.s32.totalorder %s327_s20, 3  ;;  %p123_p5 = scmp.ne.s32.totalorder %s485_s13, %s481_s12 }
   0x9   : > { %s674_s22 = smov (%p26_p0, %s25_s22), 0  ;;  %s676_s23 = smov (!%p26_p0, %s28_s23), %s505_s18 }
   0xa   : > { %s103_s24 = ssub.s32 %s501_s17, %s674_s22  ;;  %p583_p3 = por %p118_p2, %p117_p1 }
   0xb   : > { %p30_p4 = scmp.ge.s32.totalorder %s676_s23, 2  ;;  %p124_p6 = scmp.eq.s32.totalorder %s328_s21, 3 }
   0xc   : > { %p331_p7 = scmp.ge.s32.totalorder %s509_s19, 1  ;;  %p159_p9 = scmp.lt.s32.totalorder %s509_s19, 5 }
   0xd   : > { %s678_s23 = smov (%p30_p4, %s676_s23), 0  ;;  %p592_p8 = por %p124_p6, %p123_p5 }
   0xe   : > { %s102_s27 = ssub.s32 %s505_s18, %s678_s23  ;;  %s107_s28 = sadd.s32 1, %s489_s14 }
   0xf   : > { %s104_s29 = sor.u32 %s103_s24, %s102_s27  ;;  %p160_p10 = pnand %p331_p7, %p159_p9 }
  0x10   : > { %p105_p11 = scmp.eq.s32.totalorder %s104_s29, 0  ;;  %p186_p12 = scmp.lt.s32.totalorder (!%p160_p10), %s497_s16, 1 }
  0x11   : > { %163 = sbr.rel (%p160_p10) target bundleno = 161 (0xa1), region = 32  ;;  %p188_p13 = scmp.lt.s32.totalorder (!%p160_p10), %s493_s15, 1 }
  0x12   : > { %s601_s30 = scalar_select %p105_p11, %s489_s14, %s107_s28  }
  0x13   : > { %s338_s28 = sshll.u32 (!%p160_p10), %s497_s16, 1  ;;  %s183_s29 = sand.u32 (!%p160_p10), 1, %s485_s13  }
  0x14   : > { %s242_s4 = sadd.s32 (!%p160_p10), %s493_s15, %s338_s28  ;;  %s332_s5 = sshll.u32 (!%p160_p10), %s183_s29, 3 }
  0x15   : > { %s435_s28 = scalar_lea.hbm (!%p160_p10), %s663_s3, 32 }
  0x16   : > { %v511_v0 = vmov 0   ;;  %v196_v1 = vld [vmem:[%s661_s1] sm:$0xff]  ;;  %s187_s6 = scalar_select %p186_p12, %s497_s16, 1  ;;  %vm206_vm0 = vcmask 1043456   ;;  %vm202_vm1 = vcmask 31744  }
  0x17   : > { %414 = vset.pattern.permute.xlu0 %v511_v0  ;;  %s189_s7 = scalar_select %p188_p13, %s493_s15, 1  ;;  %v194_v2 = vld [vmem:[%s660_s0] sm:$0xff] }
  0x18   : > { %199 = vperm.xlu0 %414, %v196_v1   ;;  %s333_s8 = sshll.u32 %s187_s6, 1  ;;  %s339_s6 = sshll.u32 %s242_s4, 3 }
  0x19   : > { %s191_s9 = sadd.s32 %s333_s8, %s189_s7 }
  0x1a   : > { %s334_s10 = sshll.u32 %s191_s9, 2  ;;  %s244_s9 = scalar_lea.hbm %s663_s3, %s339_s6 }
  0x1b   : > { %s193_s21 = scalar_lea.vmem %s662_s2, %s334_s10  ;;  %s185_s10 = scalar_lea.vmem [#allocation2], %s332_s5 }
  0x1c   : > { %v195_v3 = vld [vmem:[%s193_s21] sm:$0xf]  ;;  %s246_s11 = sshll.u32 %s185_s10, 4  ;;  %s248_s20 = sshll.u32 %s244_s9, 4  ;;  %s247_s11 = int_to_ptr.vmem [resolvable:$true] %s246_s11  ;;  %s249_s20 = int_to_ptr.hbm [resolvable:$true] %s248_s20 }
  0x1d   : > { %335 = vmatpush.msk.msra.mxu0 %vm206_vm0, %v195_v3  ;;  %s232_s21 = scalar_lea.sflag [#allocation3], %s183_s29  ;;  %s429_s16 = sshra.s32 %s249_s20, 4  ;;  %s430_s16 = int_to_ptr.hbm [resolvable:$true] %s429_s16 }
  0x1e   : > { %336 = vmatmul.msk.f32.vlgmr.msra.gmra.mxu0 %vm202_vm1, %v194_v2  ;;  %s431_s15 = scalar_lea.hbm %s430_s16, 8  ;;  %p436_p4 = scmp.lt.s32.totalorder %s430_s16, %s663_s3 }
  0x1f   : > { %p432_p0 = scmp.ne.s32.totalorder %s430_s16, %s431_s15  ;;  %p437_p5 = scmp.lt.s32.totalorder %s435_s28, %s431_s15 }
  0x21   : > { %p433_p1 = pnand %p432_p0, %p583_p3  ;;  %p438_p6 = por %p437_p5, %p436_p4 }
  0x23   : > { %p434_p2 = pneg %p433_p1 }
  0x25   : > { %p439_p7 = pnand %p438_p6, %p434_p2 }
  0x8a   : > { %v200_v4 = vpop.permute.xlu0 %199 }
  0x9b   : > { %v227_v5 = vpop.f32.mrf.mxu0 }
  0x9c   : > { %v228_v6 = vadd.f32 %v227_v5, %v200_v4 }
  0x9e   : > { %230 = vst [vmem:[%s185_s10] sm:$0xff] %v228_v6 }
  0x9f   : > { %442 = shalt.err (!%p439_p7)
}
  0xa0   : > { %342 = dma.vmem_to_hbm [thread:$0]  (%p583_p3), %s247_s11, 128, %s249_s20, %s232_s21  }
  0xa1 PF: > { %p348_p9 = scmp.ge.s32.totalorder %s509_s19, 2  ;;  %s260_s29 = sand.u32 1, %s481_s12  }
  0xa2   : > { %s261_s6 = scalar_lea.sflag [#allocation3], %s260_s29 }
  0xa3   : > { %p345_p10 = pnand %p348_p9, %p592_p8 }
  0xa5   : > { %p346_p11 = pneg %p345_p10 }
  0xa7   : > { %476 = dma.done.wait (%p346_p11), %s261_s6, 128  }
  0xa8   : > { %478 = vsyncadd (%p346_p11), %s261_s6, 4294967168  ;;  %s16_s19 = sadd.s32 1, %s509_s19   ;;  %s666_s12 = smov %s485_s13 }
  0xa9   : > { %p13_p12 = scmp.ge.s32.totalorder %s16_s19, 6   ;;  %s667_s13 = smov %s489_s14 }
  0xaa   : > { %s668_s14 = smov %s601_s30  ;;  %s669_s15 = smov %s501_s17 }
  0xab   : > { %s670_s16 = smov %s505_s18  ;;  %s671_s17 = smov %s674_s22 }
  0xac   : > { %s672_s18 = smov %s678_s23  ;;  %15 = sbr.rel (!%p13_p12) target bundleno = 5 (0x5), region = 67 }
  0xb1   :  { %267 = vsyncpa [#allocation3], 1 }
  0xb2   :  { %269 = vsyncpa [#allocation3 + $0x1], 1 }

</bundles_post_ra>
